<compile_context>
chip_gen: v5e
topology: v5e:2x2
jax: 0.10.0
libtpu: 0.0.40
codegen_flags: <defaults>
</compile_context>

<pallas_src>
import functools

import jax
import jax.numpy as jnp
from jax.experimental import pallas as pl
from jax.experimental.pallas import tpu as pltpu


def _mlp_kernel(x_ref, w1_ref, b1_ref, w2_ref, b2_ref, w3_ref, b3_ref, o_ref):
    """All three matmuls + ReLUs fused, one invocation per batch tile."""
    cdt = w1_ref.dtype  # MXU compute dtype (bf16 by default)
    x = x_ref[...]
    # Layer 1: MXU matmul in compute dtype with f32 accumulation; bias + ReLU
    # stay in f32 on the VPU.
    h = jnp.dot(x, w1_ref[...], preferred_element_type=jnp.float32) + b1_ref[...]
    h = jnp.maximum(h, 0.0)
    # Layer 2
    h = jnp.dot(h.astype(cdt), w2_ref[...],
                preferred_element_type=jnp.float32) + b2_ref[...]
    h = jnp.maximum(h, 0.0)
    # Layer 3 (output features lane-padded to a multiple of 128)
    out = jnp.dot(h.astype(cdt), w3_ref[...],
                  preferred_element_type=jnp.float32) + b3_ref[...]
    o_ref[...] = out.astype(o_ref.dtype)


def _choose_batch_tile(B, min_tile):
    # Prefer big tiles (fills the MXU M dim, amortizes per-step overhead) but
    # keep >= 2 grid steps when B allows so the batch axis can be sharded
    # across v7x's two TensorCores via dimension_semantics=("parallel",).
    for t in (512, 256, 128, 64, 32, 16, 8):
        if t < min_tile:
            break
        if B >= 2 * t:
            return t
    return min_tile


@functools.partial(jax.jit, static_argnames=("batch_tile", "compute_dtype"))
def predictor_forward(x, w1, b1, w2, b2, w3, b3, *, batch_tile=None,
                      compute_dtype=jnp.bfloat16):
    B, in_dim = x.shape
    hid = w1.shape[1]
    out_dim = w3.shape[1]
    out_dtype = x.dtype

    # Lane-dense output: pad the output feature dim up to a multiple of 128 so
    # the final store is an unmasked vst instead of a 16/128-lane masked one.
    out_pad = ((out_dim + 127) // 128) * 128

    # Sublane minimum: 8 rows for f32 inputs, 16 for bf16 (packed sublanes).
    min_tile = 16 if jnp.dtype(compute_dtype) == jnp.dtype(jnp.bfloat16) else 8
    if batch_tile is None:
        batch_tile = _choose_batch_tile(B, min_tile)
    batch_tile = max(min_tile, batch_tile)
    B_pad = pl.cdiv(B, batch_tile) * batch_tile

    # Cast matmul operands to the MXU compute dtype; biases stay f32.
    xc = x.astype(compute_dtype)
    if B_pad != B:
        xc = jnp.pad(xc, ((0, B_pad - B), (0, 0)))
    w1c = w1.astype(compute_dtype)
    w2c = w2.astype(compute_dtype)
    w3c = jnp.pad(w3, ((0, 0), (0, out_pad - out_dim))).astype(compute_dtype)
    b1f = b1.astype(jnp.float32)
    b2f = b2.astype(jnp.float32)
    b3f = jnp.pad(b3, ((0, 0), (0, out_pad - out_dim))).astype(jnp.float32)

    grid = (B_pad // batch_tile,)

    c_item = jnp.dtype(compute_dtype).itemsize
    o_item = jnp.dtype(out_dtype).itemsize
    cost = pl.CostEstimate(
        flops=2 * B_pad * (in_dim * hid + hid * hid + hid * out_pad),
        transcendentals=0,
        bytes_accessed=(B_pad * in_dim * c_item
                        + (in_dim * hid + hid * hid + hid * out_pad) * c_item
                        + (hid + hid + out_pad) * 4
                        + B_pad * out_pad * o_item),
    )

    out_padded = pl.pallas_call(
        _mlp_kernel,
        out_shape=jax.ShapeDtypeStruct((B_pad, out_pad), out_dtype),
        grid_spec=pltpu.PrefetchScalarGridSpec(
            num_scalar_prefetch=0,
            grid=grid,
            in_specs=[
                # x: tiled over batch
                pl.BlockSpec((batch_tile, in_dim), lambda i: (i, 0)),
                # weights / biases: grid-invariant (DMA'd once, reused)
                pl.BlockSpec((in_dim, hid), lambda i: (0, 0)),
                pl.BlockSpec((1, hid), lambda i: (0, 0)),
                pl.BlockSpec((hid, hid), lambda i: (0, 0)),
                pl.BlockSpec((1, hid), lambda i: (0, 0)),
                pl.BlockSpec((hid, out_pad), lambda i: (0, 0)),
                pl.BlockSpec((1, out_pad), lambda i: (0, 0)),
            ],
            out_specs=pl.BlockSpec((batch_tile, out_pad), lambda i: (i, 0)),
        ),
        compiler_params=pltpu.CompilerParams(
            dimension_semantics=("parallel",)),
        cost_estimate=cost,
    )(xc, w1c, b1f, w2c, b2f, w3c, b3f)

    # Slice off batch padding and the lane padding on the output features.
    return out_padded[:B, :out_dim]


def init_predictor_params(key, in_dim, out_dim, hid=128, dtype=jnp.float32):
    """Deterministic init matching PredictorNetwork.__init__:
    orthogonal weights (gain=1.0), zero biases."""
    k1, k2, k3 = jax.random.split(key, 3)
    ortho = jax.nn.initializers.orthogonal(scale=1.0)
    # Stored as (in_features, out_features) — transpose of PyTorch layout.
    w1 = ortho(k1, (in_dim, hid), dtype)
    w2 = ortho(k2, (hid, hid), dtype)
    w3 = ortho(k3, (hid, out_dim), dtype)
    b1 = jnp.zeros((1, hid), dtype)
    b2 = jnp.zeros((1, hid), dtype)
    b3 = jnp.zeros((1, out_dim), dtype)
    return w1, b1, w2, b2, w3, b3


def reference_forward(x, w1, b1, w2, b2, w3, b3):
    h1 = jnp.maximum(x @ w1 + b1, 0.0)
    h2 = jnp.maximum(h1 @ w2 + b2, 0.0)
    return h2 @ w3 + b3


if __name__ == "__main__":
    key = jax.random.PRNGKey(0)
    kx, kp = jax.random.split(key)

    B, in_dim, hid, out_dim = 32, 32, 128, 16
    x = jax.random.normal(kx, (B, in_dim), jnp.float32)
    params = init_predictor_params(kp, in_dim, out_dim, hid=hid)

    ref = reference_forward(x, *params)

    # Default (bf16 MXU inputs, f32 accumulation) path.
    out = jax.block_until_ready(predictor_forward(x, *params))
    assert out.shape == (B, out_dim)
    assert jnp.allclose(out, ref, atol=1e-1, rtol=1e-1), "bf16 path mismatch"

    # Full-f32 path sanity check (tight tolerance vs. the XLA reference).
    out_f32 = jax.block_until_ready(
        predictor_forward(x, *params, compute_dtype=jnp.float32))
    assert jnp.allclose(out_f32, ref, atol=1e-3, rtol=1e-3), "f32 path mismatch"

    print("KERNEL_OK")
</pallas_src>

<mosaic_0001>
module attributes {stable_mosaic.version = 11 : i64} {
  func.func @_mlp_kernel(%arg0: i32, %arg1: memref<16x32xbf16, #tpu.memory_space<vmem>>, %arg2: memref<32x128xbf16, #tpu.memory_space<vmem>>, %arg3: memref<1x128xf32, #tpu.memory_space<vmem>>, %arg4: memref<128x128xbf16, #tpu.memory_space<vmem>>, %arg5: memref<1x128xf32, #tpu.memory_space<vmem>>, %arg6: memref<128x128xbf16, #tpu.memory_space<vmem>>, %arg7: memref<1x128xf32, #tpu.memory_space<vmem>>, %arg8: memref<16x128xf32, #tpu.memory_space<vmem>>) attributes {dimension_semantics = [#tpu.dimension_semantics<parallel>], iteration_bounds = array<i64: 2>, scalar_prefetch = 0 : i64, scratch_operands = 0 : i64, tpu.core_type = #tpu.core_type<tc>, window_params = [{transform_indices = @transform_0, window_bounds = array<i64: 16, 32>}, {pipeline_mode = #tpu.pipeline_mode<synchronous>, transform_indices = @transform_1, window_bounds = array<i64: 32, 128>}, {pipeline_mode = #tpu.pipeline_mode<synchronous>, transform_indices = @transform_2, window_bounds = array<i64: 1, 128>}, {pipeline_mode = #tpu.pipeline_mode<synchronous>, transform_indices = @transform_3, window_bounds = array<i64: 128, 128>}, {pipeline_mode = #tpu.pipeline_mode<synchronous>, transform_indices = @transform_4, window_bounds = array<i64: 1, 128>}, {pipeline_mode = #tpu.pipeline_mode<synchronous>, transform_indices = @transform_5, window_bounds = array<i64: 128, 128>}, {pipeline_mode = #tpu.pipeline_mode<synchronous>, transform_indices = @transform_6, window_bounds = array<i64: 1, 128>}, {transform_indices = @transform_7, window_bounds = array<i64: 16, 128>}]} {
    %c0 = arith.constant 0 : index
    %c0_0 = arith.constant 0 : index
    %0 = vector.load %arg1[%c0, %c0_0] : memref<16x32xbf16, #tpu.memory_space<vmem>>, vector<16x32xbf16>
    %c0_1 = arith.constant 0 : index
    %c0_2 = arith.constant 0 : index
    %1 = vector.load %arg2[%c0_1, %c0_2] : memref<32x128xbf16, #tpu.memory_space<vmem>>, vector<32x128xbf16>
    %cst = arith.constant dense<0.000000e+00> : vector<16x128xf32>
    %2 = tpu.matmul %0, %1, %cst {dimension_numbers = #tpu.dot_dimension_numbers<[1], [0], [0], [1], [0, 0, 1, 1], [], []>} : vector<16x32xbf16>, vector<32x128xbf16>, vector<16x128xf32> -> vector<16x128xf32>
    %c0_3 = arith.constant 0 : index
    %c0_4 = arith.constant 0 : index
    %3 = vector.load %arg3[%c0_3, %c0_4] : memref<1x128xf32, #tpu.memory_space<vmem>>, vector<1x128xf32>
    %4 = vector.broadcast %3 : vector<1x128xf32> to vector<16x128xf32>
    %5 = arith.addf %2, %4 : vector<16x128xf32>
    %cst_5 = arith.constant 0.000000e+00 : f32
    %6 = vector.broadcast %cst_5 : f32 to vector<16x128xf32>
    %7 = arith.maximumf %5, %6 : vector<16x128xf32>
    %8 = arith.truncf %7 : vector<16x128xf32> to vector<16x128xbf16>
    %c0_6 = arith.constant 0 : index
    %c0_7 = arith.constant 0 : index
    %9 = vector.load %arg4[%c0_6, %c0_7] : memref<128x128xbf16, #tpu.memory_space<vmem>>, vector<128x128xbf16>
    %cst_8 = arith.constant dense<0.000000e+00> : vector<16x128xf32>
    %10 = tpu.matmul %8, %9, %cst_8 {dimension_numbers = #tpu.dot_dimension_numbers<[1], [0], [0], [1], [0, 0, 1, 1], [], []>} : vector<16x128xbf16>, vector<128x128xbf16>, vector<16x128xf32> -> vector<16x128xf32>
    %c0_9 = arith.constant 0 : index
    %c0_10 = arith.constant 0 : index
    %11 = vector.load %arg5[%c0_9, %c0_10] : memref<1x128xf32, #tpu.memory_space<vmem>>, vector<1x128xf32>
    %12 = vector.broadcast %11 : vector<1x128xf32> to vector<16x128xf32>
    %13 = arith.addf %10, %12 : vector<16x128xf32>
    %cst_11 = arith.constant 0.000000e+00 : f32
    %14 = vector.broadcast %cst_11 : f32 to vector<16x128xf32>
    %15 = arith.maximumf %13, %14 : vector<16x128xf32>
    %16 = arith.truncf %15 : vector<16x128xf32> to vector<16x128xbf16>
    %c0_12 = arith.constant 0 : index
    %c0_13 = arith.constant 0 : index
    %17 = vector.load %arg6[%c0_12, %c0_13] : memref<128x128xbf16, #tpu.memory_space<vmem>>, vector<128x128xbf16>
    %cst_14 = arith.constant dense<0.000000e+00> : vector<16x128xf32>
    %18 = tpu.matmul %16, %17, %cst_14 {dimension_numbers = #tpu.dot_dimension_numbers<[1], [0], [0], [1], [0, 0, 1, 1], [], []>} : vector<16x128xbf16>, vector<128x128xbf16>, vector<16x128xf32> -> vector<16x128xf32>
    %c0_15 = arith.constant 0 : index
    %c0_16 = arith.constant 0 : index
    %19 = vector.load %arg7[%c0_15, %c0_16] : memref<1x128xf32, #tpu.memory_space<vmem>>, vector<1x128xf32>
    %20 = vector.broadcast %19 : vector<1x128xf32> to vector<16x128xf32>
    %21 = arith.addf %18, %20 : vector<16x128xf32>
    %c0_17 = arith.constant 0 : index
    %c0_18 = arith.constant 0 : index
    %22 = vector.load %arg8[%c0_17, %c0_18] : memref<16x128xf32, #tpu.memory_space<vmem>>, vector<16x128xf32>
    tpu.vector_store %arg8[%c0_17, %c0_18], %21 {strides = array<i32>} : memref<16x128xf32, #tpu.memory_space<vmem>>, vector<16x128xf32>,
    return
  }
  func.func @transform_0(%arg0: i32) -> (i32, i32) {
    %c0_i32 = arith.constant 0 : i32
    %c0_i32_0 = arith.constant 0 : i32
    return %arg0, %c0_i32 : i32, i32
  }
  func.func @transform_1(%arg0: i32) -> (i32, i32) {
    %c0_i32 = arith.constant 0 : i32
    %c0_i32_0 = arith.constant 0 : i32
    %c0_i32_1 = arith.constant 0 : i32
    return %c0_i32, %c0_i32_0 : i32, i32
  }
  func.func @transform_2(%arg0: i32) -> (i32, i32) {
    %c0_i32 = arith.constant 0 : i32
    %c0_i32_0 = arith.constant 0 : i32
    %c0_i32_1 = arith.constant 0 : i32
    return %c0_i32, %c0_i32_0 : i32, i32
  }
  func.func @transform_3(%arg0: i32) -> (i32, i32) {
    %c0_i32 = arith.constant 0 : i32
    %c0_i32_0 = arith.constant 0 : i32
    %c0_i32_1 = arith.constant 0 : i32
    return %c0_i32, %c0_i32_0 : i32, i32
  }
  func.func @transform_4(%arg0: i32) -> (i32, i32) {
    %c0_i32 = arith.constant 0 : i32
    %c0_i32_0 = arith.constant 0 : i32
    %c0_i32_1 = arith.constant 0 : i32
    return %c0_i32, %c0_i32_0 : i32, i32
  }
  func.func @transform_5(%arg0: i32) -> (i32, i32) {
    %c0_i32 = arith.constant 0 : i32
    %c0_i32_0 = arith.constant 0 : i32
    %c0_i32_1 = arith.constant 0 : i32
    return %c0_i32, %c0_i32_0 : i32, i32
  }
  func.func @transform_6(%arg0: i32) -> (i32, i32) {
    %c0_i32 = arith.constant 0 : i32
    %c0_i32_0 = arith.constant 0 : i32
    %c0_i32_1 = arith.constant 0 : i32
    return %c0_i32, %c0_i32_0 : i32, i32
  }
  func.func @transform_7(%arg0: i32) -> (i32, i32) {
    %c0_i32 = arith.constant 0 : i32
    %c0_i32_0 = arith.constant 0 : i32
    return %arg0, %c0_i32 : i32, i32
  }
}

</mosaic_0001>

<bundles_post_ra>
// kernel: predictor_forward.1
= control target key start
LH: loop header
LB: loop body
LE: loop exit
PB: predicated region body
PF: predicated region fallthrough
CT: control target
= control target key end

     0   :  { %s722_s24 = smov 0   ;;  %s806_s0 = inlined_call_operand.vmem [shape: bf16[32,32], index: 0, kind: input, shape index: {}]   ;;  %s807_s1 = inlined_call_operand.vmem [shape: bf16[32,128], index: 1, kind: input, shape index: {}]   ;;  %s808_s2 = inlined_call_operand.vmem [shape: f32[1,128], index: 2, kind: input, shape index: {}]   ;;  %s809_s3 = inlined_call_operand.vmem [shape: bf16[128,128], index: 3, kind: input, shape index: {}]   ;;  %s810_s4 = inlined_call_operand.vmem [shape: f32[1,128], index: 4, kind: input, shape index: {}]   ;;  %s811_s5 = inlined_call_operand.vmem [shape: bf16[128,128], index: 5, kind: input, shape index: {}]   ;;  %s812_s6 = inlined_call_operand.vmem [shape: f32[1,128], index: 6, kind: input, shape index: {}]   ;;  %s813_s7 = inlined_call_operand.vmem [shape: f32[32,128], index: 7, kind: output, shape index: {}]  }
   0x1 LB: > { %s556_s25 = sadd.s32 4294967295, %s680_s24   ;;  %p560_p0 = scmp.ge.s32.totalorder %s680_s24, 1  ;;  %s680_s24 = sphi %s722_s24, %s17_s24  }
   0x2   : > { %p238_p1 = scmp.lt.s32.totalorder %s680_s24, 3 }
   0x4   : > { %p239_p2 = pnand %p560_p0, %p238_p1 }
   0x5   : > { %s561_s28 = sshll.u32 (!%p239_p2), %s556_s25, 1 }
   0x6   : > { %242 = sbr.rel (%p239_p2) target bundleno = 442 (0x1ba), region = 48  ;;  %p271_p3 = scmp.lt.s32.totalorder (!%p239_p2), %s561_s28, 3 }
   0xb   : > { %v646_v0 = vld [vmem:[%s807_s1 + $0x8] sm:$0xff]  ;;  %v654_v1 = vld [vmem:[%s809_s3 + $0x38] sm:$0xff]  ;;  %v645_v2 = vld [vmem:[%s807_s1] sm:$0xff]  ;;  %s815_s28 = smov (!%p271_p3, %s561_s28), 3  ;;  %vm310_vm0 = vcmask 261120  }
   0xc   : > { %320 = vmatpush.bf16.msra.mxu0 %v646_v0  ;;  %399 = vmatpush.bf16.msra.mxu1 %v654_v1  ;;  %v653_v3 = vld [vmem:[%s809_s3 + $0x30] sm:$0xff]  ;;  %s562_s12 = sshll.u32 %s815_s28, 2  ;;  %v652_v4 = vld [vmem:[%s809_s3 + $0x28] sm:$0xff]  ;;  %v651_v6 = vld [vmem:[%s809_s3 + $0x20] sm:$0xff]  ;;  %s564_s29 = sshll.u32 %s815_s28, 3 }
   0xd   : > { %s274_s15 = scalar_lea.vmem %s806_s0, %s562_s12  ;;  %v650_v7 = vld [vmem:[%s809_s3 + $0x18] sm:$0xff]  ;;  %v649_v8 = vld [vmem:[%s809_s3 + $0x10] sm:$0xff]  ;;  %v648_v9 = vld [vmem:[%s809_s3 + $0x8] sm:$0xff]  ;;  %s280_s11 = scalar_lea.vmem %s813_s7, %s564_s29 }
   0xe   : > { %v644_v5 = vld [vmem:[%s274_s15] sm:$0xff]  ;;  %v662_v11 = vld [vmem:[%s811_s5 + $0x38] sm:$0xff]  ;;  %v661_v12 = vld [vmem:[%s811_s5 + $0x30] sm:$0xff] }
   0xf   : > { %v647_v10 = vld [vmem:[%s809_s3] sm:$0xff]  ;;  %484 = vmatpush.bf16.msra.mxu2 %v662_v11  ;;  %v660_v13 = vld [vmem:[%s811_s5 + $0x28] sm:$0xff]  ;;  %v658_v23 = vld [vmem:[%s811_s5 + $0x18] sm:$0xff] }
  0x10   : > { %321 = vmatpush.bf16.msra.mxu0 %v645_v2  ;;  %400 = vmatpush.bf16.msra.mxu1 %v653_v3  ;;  %v659_v14 = vld [vmem:[%s811_s5 + $0x20] sm:$0xff]  ;;  %v657_v24 = vld [vmem:[%s811_s5 + $0x10] sm:$0xff]  ;;  %v656_v25 = vld [vmem:[%s811_s5 + $0x8] sm:$0xff] }
  0x11   : > { %v671_v16 = vld [vmem:[%s808_s2] ss:$0 sm:$0xff] }
  0x12   : > { %v655_v26 = vld [vmem:[%s811_s5] sm:$0xff] }
  0x13   : > { %577 = vmatmul.msk.bf16.vlgmr.msra.gmra.mxu0 %vm310_vm0, %v644_v5  ;;  %485 = vmatpush.bf16.msra.mxu2 %v661_v12  ;;  %v672_v28 = vld [vmem:[%s810_s4] ss:$0 sm:$0xff] }
  0x14   : > { %401 = vmatpush.bf16.msra.mxu1 %v652_v4  ;;  %v673_v35 = vld [vmem:[%s812_s6] ss:$0 sm:$0xff] }
  0x17   : > { %486 = vmatpush.bf16.msra.mxu2 %v660_v13 }
  0x18   : > { %402 = vmatpush.bf16.msra.mxu1 %v651_v6 }
  0x1b   : > { %487 = vmatpush.bf16.msra.mxu2 %v659_v14 }
  0x1c   : > { %403 = vmatpush.bf16.msra.mxu1 %v650_v7 }
  0x1f   : > { %488 = vmatpush.bf16.msra.mxu2 %v658_v23 }
  0x20   : > { %404 = vmatpush.bf16.msra.mxu1 %v649_v8 }
  0x23   : > { %489 = vmatpush.bf16.msra.mxu2 %v657_v24 }
  0x24   : > { %405 = vmatpush.bf16.msra.mxu1 %v648_v9 }
  0x27   : > { %490 = vmatpush.bf16.msra.mxu2 %v656_v25 }
  0x28   : > { %406 = vmatpush.bf16.msra.mxu1 %v647_v10 }
  0x2b   : > { %491 = vmatpush.bf16.msra.mxu2 %v655_v26 }
  0x90   : > { %v323_v15 = vpop.f32.mrf.mxu0 }
  0x91   : > { %v324_v17 = vadd.f32 %v671_v16, %v323_v15 }
  0x93   : > { %v328_v20 = vmax.f32 %v324_v17, 0.0 }
  0x98   : > { %v325_v18 = vpop.f32.mrf.mxu0 }
  0x99   : > { %v326_v19 = vadd.f32 %v671_v16, %v325_v18 }
  0x9b   : > { %v329_v21 = vmax.f32 %v326_v19, 0.0 }
  0x9d   : > { %v330_v22 = vpack.c.bf16 %v329_v21, %v328_v20 }
  0x9f   : > { %407 = vmatmul.bf16.vlgmr.msra.gmra.mxu1 %v330_v22 }
 0x11c   : > { %v408_v27 = vpop.f32.mrf.mxu1 }
 0x11d   : > { %v409_v29 = vadd.f32 %v672_v28, %v408_v27 }
 0x11f   : > { %v413_v32 = vmax.f32 %v409_v29, 0.0 }
 0x124   : > { %v410_v30 = vpop.f32.mrf.mxu1 }
 0x125   : > { %v411_v31 = vadd.f32 %v672_v28, %v410_v30 }
 0x127   : > { %v414_v33 = vmax.f32 %v411_v31, 0.0 }
 0x129   : > { %v415_v34 = vpack.c.bf16 %v414_v33, %v413_v32 }
 0x12b   : > { %492 = vmatmul.bf16.vlgmr.msra.gmra.mxu2 %v415_v34 }
 0x1ae   : > { %v493_v36 = vpop.f32.mrf.mxu2 }
 0x1af   : > { %v494_v37 = vadd.f32 %v673_v35, %v493_v36 }
 0x1b1   : > { %498 = vst [vmem:[%s280_s11] sm:$0xff] %v494_v37 }
 0x1b6   : > { %v495_v38 = vpop.f32.mrf.mxu2 }
 0x1b7   : > { %v496_v39 = vadd.f32 %v673_v35, %v495_v38 }
 0x1b9   : > { %499 = vst [vmem:[%s280_s11 + $0x8] sm:$0xff] %v496_v39 }
 0x1ba PF: > { %s17_s24 = sadd.s32 1, %s680_s24  }
 0x1bb   : > { %p14_p4 = scmp.ge.s32.totalorder %s17_s24, 4  }
 0x1bd   :  { %16 = sbr.rel (!%p14_p4) target bundleno = 1 (0x1), region = 78 }

</bundles_post_ra>
